<compile_context>
chip_gen: v6e
topology: v6e:2x2x1
jax: 0.10.0
libtpu: 0.0.40
codegen_flags: <defaults>
</compile_context>

<pallas_src>
import functools

import jax
import jax.numpy as jnp
from jax.experimental import pallas as pl
from jax.experimental.pallas import tpu as pltpu


# ----------------------------------------------------------------------------
# Kernel 1: "encoder stand-in (last row only) + generator MLP".
#   h_last = tanh(prompt_emb[P-1] @ W_enc + b_enc)   (1, E)
#   z1     = relu(h_last @ W1 + b1)                  (1, E//2)
#   out    = z1 @ W2 + b2                            (1, P*D)
# Batch-invariant (prompt indices are range(P) for every row), so computed once.
# ----------------------------------------------------------------------------
def _prompt_mlp_kernel(pe_ref, wenc_ref, benc_ref, w1_ref, b1_ref,
                       w2_ref, b2_ref, out_ref, *, prompt_length):
    # prompt attention mask is all ones => sequence_lengths = P - 1 (static).
    # The synthetic encoder is row-wise, so only the last prompt row is needed
    # (identical numerics to running all P rows and selecting row P-1).
    pe_last = pe_ref[prompt_length - 1:prompt_length, :]              # (1, E)
    h_last = jnp.tanh(
        jnp.dot(pe_last, wenc_ref[...], preferred_element_type=jnp.float32)
        + benc_ref[...]
    )
    z1 = jnp.maximum(
        jnp.dot(h_last, w1_ref[...], preferred_element_type=jnp.float32)
        + b1_ref[...],
        0.0,
    )
    out_ref[...] = (
        jnp.dot(z1, w2_ref[...], preferred_element_type=jnp.float32)
        + b2_ref[...]
    )


def prompt_representation(prompt_table, w_enc, b_enc, w1, b1, w2, b2,
                          *, prompt_length, embedding_dim):
    """Returns (P, D) input-dependent prompt representation (batch-invariant)."""
    kernel = functools.partial(_prompt_mlp_kernel, prompt_length=prompt_length)
    flat = pl.pallas_call(
        kernel,
        out_shape=jax.ShapeDtypeStruct((1, prompt_length * embedding_dim),
                                       jnp.float32),
        in_specs=[pl.BlockSpec(memory_space=pltpu.MemorySpace.VMEM)] * 7,
        out_specs=pl.BlockSpec(memory_space=pltpu.MemorySpace.VMEM),
    )(prompt_table, w_enc, b_enc, w1, b1, w2, b2)
    return flat.reshape(prompt_length, embedding_dim)


# ----------------------------------------------------------------------------
# Kernel 2 (fused): token-embedding gather + prompt broadcast + concat.
# Grid over batch (parallel). Per batch row:
#   * L per-token row DMAs stream HBM table rows straight into their final
#     slots [P, P+L) of the (P+L, D) output block (table never enters VMEM),
#   * the batch-invariant prompt representation is written into rows [0, P)
#     while those DMAs are in flight,
#   * all DMA completions are collected before the body ends so the pipeline
#     writeback sees complete data.
# ----------------------------------------------------------------------------
def _fused_embed_concat_kernel(ids_ref, prompt_ref, table_hbm, out_ref,
                               copy_sem, *, prompt_length, seq_len):
    b = pl.program_id(0)

    # Issue one row DMA per token: HBM table row -> its final output row.
    # All copies are independent and identical in size; they share one DMA
    # semaphore and fly concurrently.
    copies = []
    for l in range(seq_len):                       # seq_len is static & small
        tok = ids_ref[b, l]                        # SMEM scalar read
        copies.append(
            pltpu.make_async_copy(table_hbm.at[tok],
                                  out_ref.at[prompt_length + l],
                                  copy_sem))
    for cp in copies:
        cp.start()

    # Overlap: write the (batch-invariant) prompt block into rows [0, P)
    # while the gather DMAs are in flight (disjoint rows, no hazard).
    out_ref[0:prompt_length, :] = prompt_ref[...]

    # Collect completions before the output block is written back.
    for cp in copies:
        cp.wait()


def fused_embed_concat(input_ids, prompt_rep, emb_table, *, prompt_length):
    """input_ids (B, L) int32, prompt_rep (P, D), emb_table (V, D) in HBM
    -> (B, P+L, D): rows [0,P) = prompt_rep, rows [P,P+L) = table[input_ids]."""
    B, L = input_ids.shape
    _, D = emb_table.shape
    P = prompt_length
    kernel = functools.partial(_fused_embed_concat_kernel,
                               prompt_length=P, seq_len=L)
    return pl.pallas_call(
        kernel,
        out_shape=jax.ShapeDtypeStruct((B, P + L, D), emb_table.dtype),
        grid_spec=pltpu.PrefetchScalarGridSpec(
            num_scalar_prefetch=1,                 # input_ids -> SMEM
            grid=(B,),
            in_specs=[
                # prompt representation: small, resident in VMEM (same block
                # every grid step).
                pl.BlockSpec((P, D), lambda b, ids: (0, 0)),
                # embedding table stays in HBM; rows are gathered via DMA.
                pl.BlockSpec(memory_space=pl.ANY),
            ],
            out_specs=pl.BlockSpec((None, P + L, D), lambda b, ids: (b, 0, 0)),
            scratch_shapes=[pltpu.SemaphoreType.DMA(())],
        ),
        compiler_params=pltpu.CompilerParams(
            # batch rows are independent -> shard across TCs on v7x megacore.
            dimension_semantics=("parallel",)),
    )(input_ids.astype(jnp.int32), prompt_rep, emb_table)


# ----------------------------------------------------------------------------
# Wrapper reproducing PromptEncoderInputProcessor.forward (jitted so the two
# pallas_calls and the tiny mask concat can overlap / fuse at the XLA level).
# ----------------------------------------------------------------------------
@functools.partial(jax.jit, static_argnames=("prompt_length", "embedding_dim"))
def prompt_encoder_input_processor(input_ids, attention_mask, params,
                                   *, prompt_length, embedding_dim):
    B, L = input_ids.shape

    # prompt indices are range(P) for every batch row -> prompt_embeddings is
    # simply the (P, E) table; encoder + generator are batch-invariant.
    prompt_rep = prompt_representation(
        params["prompt_table"],
        params["w_enc"], params["b_enc"],
        params["w1"], params["b1"],
        params["w2"], params["b2"],
        prompt_length=prompt_length, embedding_dim=embedding_dim,
    )                                                        # (P, D)

    # Fused gather + broadcast + concat: writes the full (B, P+L, D) output
    # in a single pass (no separate jnp.concatenate over the big tensor).
    final_input_embeddings = fused_embed_concat(
        input_ids, prompt_rep, params["emb_table"],
        prompt_length=prompt_length)

    # Attention-mask concat is tiny (B, P+L) -> plain XLA.
    final_attention_mask = jnp.concatenate(
        [jnp.ones((B, prompt_length), jnp.float32),
         attention_mask.astype(jnp.float32)],
        axis=1,
    )

    assert final_input_embeddings.shape == (B, L + prompt_length, embedding_dim)
    assert final_attention_mask.shape == (B, L + prompt_length)
    return final_input_embeddings, final_attention_mask


# ----------------------------------------------------------------------------
# Deterministic parameter construction + demo run.
# ----------------------------------------------------------------------------
def make_params(key, *, vocab, embedding_dim, encoder_dim, prompt_length):
    E, D, P = encoder_dim, embedding_dim, prompt_length
    E2 = E // 2
    ks = jax.random.split(key, 8)
    norm = lambda k, shp, scale: (scale * jax.random.normal(k, shp)).astype(
        jnp.float32)
    return {
        "emb_table":    norm(ks[0], (vocab, D), 0.02),       # self.embeddings
        "prompt_table": norm(ks[1], (P, E), 0.02),           # encoder_prompt_embeddings
        "w_enc":        norm(ks[2], (E, E), 1.0 / (E ** 0.5)),   # synthetic encoder
        "b_enc":        jnp.zeros((1, E), jnp.float32),
        "w1":           norm(ks[3], (E, E2), 1.0 / (E ** 0.5)),  # Linear(E, E//2)
        "b1":           norm(ks[4], (1, E2), 0.01),
        "w2":           norm(ks[5], (E2, D * P), 1.0 / (E2 ** 0.5)),  # Linear(E//2, D*P)
        "b2":           norm(ks[6], (1, D * P), 0.01),
    }


if __name__ == "__main__":
    B, L = 2, 8            # batch, sequence length
    D = 128                # embedding_dim (lane-dense output stores)
    E = 32                 # encoder_embedding_dim (encoder.wte.embedding_dim)
    P = 4                  # config.prompt_length
    V = 64                 # vocab size

    key = jax.random.PRNGKey(0)
    k_par, k_ids = jax.random.split(key)
    params = make_params(k_par, vocab=V, embedding_dim=D,
                         encoder_dim=E, prompt_length=P)

    input_ids = jax.random.randint(k_ids, (B, L), 0, V, dtype=jnp.int32)
    attention_mask = jnp.array(
        [[1, 1, 1, 1, 1, 1, 1, 1],
         [1, 1, 1, 1, 1, 1, 0, 0]], dtype=jnp.float32)

    emb, mask = prompt_encoder_input_processor(
        input_ids, attention_mask, params,
        prompt_length=P, embedding_dim=D)
    jax.block_until_ready(emb)
    jax.block_until_ready(mask)

    assert emb.shape == (B, P + L, D)
    assert mask.shape == (B, P + L)

    # Sanity check: token rows of the fused output must equal a plain gather,
    # and the prompt block must be batch-invariant.
    ref_tok = params["emb_table"][input_ids]                 # (B, L, D)
    assert jnp.allclose(emb[:, P:, :], ref_tok, atol=1e-6)
    assert jnp.allclose(emb[0, :P, :], emb[1, :P, :], atol=1e-6)

    print("KERNEL_OK")
</pallas_src>

<mosaic_0001>
module attributes {stable_mosaic.version = 11 : i64} {
  func.func @_fused_embed_concat_kernel(%arg0: i32, %arg1: memref<2x8xi32, #tpu.memory_space<smem>>, %arg2: memref<4x128xf32, #tpu.memory_space<vmem>>, %arg3: memref<64x128xf32, #tpu.memory_space<any>>, %arg4: memref<1x12x128xf32, #tpu.memory_space<vmem>>, %arg5: memref<!tpu.dma_semaphore, #tpu.memory_space<semaphore_mem>>) attributes {dimension_semantics = [#tpu.dimension_semantics<parallel>], iteration_bounds = array<i64: 2>, scalar_prefetch = 1 : i64, scratch_operands = 1 : i64, tpu.core_type = #tpu.core_type<tc>, window_params = [{pipeline_mode = #tpu.pipeline_mode<synchronous>, transform_indices = @transform_0, window_bounds = array<i64: 4, 128>}, {}, {transform_indices = @transform_2, window_bounds = array<i64: 1, 12, 128>}]} {
    %0 = arith.index_cast %arg0 : i32 to index
    %c0 = arith.constant 0 : index
    %1 = memref.load %arg1[%0, %c0] : memref<2x8xi32, #tpu.memory_space<smem>>
    %2 = arith.index_cast %arg0 : i32 to index
    %c1 = arith.constant 1 : index
    %3 = memref.load %arg1[%2, %c1] : memref<2x8xi32, #tpu.memory_space<smem>>
    %4 = arith.index_cast %arg0 : i32 to index
    %c2 = arith.constant 2 : index
    %5 = memref.load %arg1[%4, %c2] : memref<2x8xi32, #tpu.memory_space<smem>>
    %6 = arith.index_cast %arg0 : i32 to index
    %c3 = arith.constant 3 : index
    %7 = memref.load %arg1[%6, %c3] : memref<2x8xi32, #tpu.memory_space<smem>>
    %8 = arith.index_cast %arg0 : i32 to index
    %c4 = arith.constant 4 : index
    %9 = memref.load %arg1[%8, %c4] : memref<2x8xi32, #tpu.memory_space<smem>>
    %10 = arith.index_cast %arg0 : i32 to index
    %c5 = arith.constant 5 : index
    %11 = memref.load %arg1[%10, %c5] : memref<2x8xi32, #tpu.memory_space<smem>>
    %12 = arith.index_cast %arg0 : i32 to index
    %c6 = arith.constant 6 : index
    %13 = memref.load %arg1[%12, %c6] : memref<2x8xi32, #tpu.memory_space<smem>>
    %14 = arith.index_cast %arg0 : i32 to index
    %c7 = arith.constant 7 : index
    %15 = memref.load %arg1[%14, %c7] : memref<2x8xi32, #tpu.memory_space<smem>>
    %c4_i32 = arith.constant 4 : i32
    %c0_i32 = arith.constant 0 : i32
    %16 = tpu.memref_slice %arg3[%1, %c0_i32] : memref<64x128xf32, #tpu.memory_space<any>> -> memref<1x128xf32, #tpu.memory_space<any>>
    %17 = tpu.memref_squeeze %16 : memref<1x128xf32, #tpu.memory_space<any>> -> memref<128xf32, #tpu.memory_space<any>>
    %c0_i32_0 = arith.constant 0 : i32
    %c0_i32_1 = arith.constant 0 : i32
    %18 = tpu.memref_slice %arg4[%c0_i32_0, %c4_i32, %c0_i32_1] : memref<1x12x128xf32, #tpu.memory_space<vmem>> -> memref<1x1x128xf32, #tpu.memory_space<vmem>>
    %19 = tpu.memref_squeeze %18 : memref<1x1x128xf32, #tpu.memory_space<vmem>> -> memref<128xf32, #tpu.memory_space<vmem>>
    tpu.enqueue_dma source(%17 : memref<128xf32, #tpu.memory_space<any>>) target(%19 : memref<128xf32, #tpu.memory_space<vmem>>) target_semaphore(%arg5 : memref<!tpu.dma_semaphore, #tpu.memory_space<semaphore_mem>>)
    %c5_i32 = arith.constant 5 : i32
    %c0_i32_2 = arith.constant 0 : i32
    %20 = tpu.memref_slice %arg3[%3, %c0_i32_2] : memref<64x128xf32, #tpu.memory_space<any>> -> memref<1x128xf32, #tpu.memory_space<any>>
    %21 = tpu.memref_squeeze %20 : memref<1x128xf32, #tpu.memory_space<any>> -> memref<128xf32, #tpu.memory_space<any>>
    %c0_i32_3 = arith.constant 0 : i32
    %c0_i32_4 = arith.constant 0 : i32
    %22 = tpu.memref_slice %arg4[%c0_i32_3, %c5_i32, %c0_i32_4] : memref<1x12x128xf32, #tpu.memory_space<vmem>> -> memref<1x1x128xf32, #tpu.memory_space<vmem>>
    %23 = tpu.memref_squeeze %22 : memref<1x1x128xf32, #tpu.memory_space<vmem>> -> memref<128xf32, #tpu.memory_space<vmem>>
    tpu.enqueue_dma source(%21 : memref<128xf32, #tpu.memory_space<any>>) target(%23 : memref<128xf32, #tpu.memory_space<vmem>>) target_semaphore(%arg5 : memref<!tpu.dma_semaphore, #tpu.memory_space<semaphore_mem>>)
    %c6_i32 = arith.constant 6 : i32
    %c0_i32_5 = arith.constant 0 : i32
    %24 = tpu.memref_slice %arg3[%5, %c0_i32_5] : memref<64x128xf32, #tpu.memory_space<any>> -> memref<1x128xf32, #tpu.memory_space<any>>
    %25 = tpu.memref_squeeze %24 : memref<1x128xf32, #tpu.memory_space<any>> -> memref<128xf32, #tpu.memory_space<any>>
    %c0_i32_6 = arith.constant 0 : i32
    %c0_i32_7 = arith.constant 0 : i32
    %26 = tpu.memref_slice %arg4[%c0_i32_6, %c6_i32, %c0_i32_7] : memref<1x12x128xf32, #tpu.memory_space<vmem>> -> memref<1x1x128xf32, #tpu.memory_space<vmem>>
    %27 = tpu.memref_squeeze %26 : memref<1x1x128xf32, #tpu.memory_space<vmem>> -> memref<128xf32, #tpu.memory_space<vmem>>
    tpu.enqueue_dma source(%25 : memref<128xf32, #tpu.memory_space<any>>) target(%27 : memref<128xf32, #tpu.memory_space<vmem>>) target_semaphore(%arg5 : memref<!tpu.dma_semaphore, #tpu.memory_space<semaphore_mem>>)
    %c7_i32 = arith.constant 7 : i32
    %c0_i32_8 = arith.constant 0 : i32
    %28 = tpu.memref_slice %arg3[%7, %c0_i32_8] : memref<64x128xf32, #tpu.memory_space<any>> -> memref<1x128xf32, #tpu.memory_space<any>>
    %29 = tpu.memref_squeeze %28 : memref<1x128xf32, #tpu.memory_space<any>> -> memref<128xf32, #tpu.memory_space<any>>
    %c0_i32_9 = arith.constant 0 : i32
    %c0_i32_10 = arith.constant 0 : i32
    %30 = tpu.memref_slice %arg4[%c0_i32_9, %c7_i32, %c0_i32_10] : memref<1x12x128xf32, #tpu.memory_space<vmem>> -> memref<1x1x128xf32, #tpu.memory_space<vmem>>
    %31 = tpu.memref_squeeze %30 : memref<1x1x128xf32, #tpu.memory_space<vmem>> -> memref<128xf32, #tpu.memory_space<vmem>>
    tpu.enqueue_dma source(%29 : memref<128xf32, #tpu.memory_space<any>>) target(%31 : memref<128xf32, #tpu.memory_space<vmem>>) target_semaphore(%arg5 : memref<!tpu.dma_semaphore, #tpu.memory_space<semaphore_mem>>)
    %c8_i32 = arith.constant 8 : i32
    %c0_i32_11 = arith.constant 0 : i32
    %32 = tpu.memref_slice %arg3[%9, %c0_i32_11] : memref<64x128xf32, #tpu.memory_space<any>> -> memref<1x128xf32, #tpu.memory_space<any>>
    %33 = tpu.memref_squeeze %32 : memref<1x128xf32, #tpu.memory_space<any>> -> memref<128xf32, #tpu.memory_space<any>>
    %c0_i32_12 = arith.constant 0 : i32
    %c0_i32_13 = arith.constant 0 : i32
    %34 = tpu.memref_slice %arg4[%c0_i32_12, %c8_i32, %c0_i32_13] : memref<1x12x128xf32, #tpu.memory_space<vmem>> -> memref<1x1x128xf32, #tpu.memory_space<vmem>>
    %35 = tpu.memref_squeeze %34 : memref<1x1x128xf32, #tpu.memory_space<vmem>> -> memref<128xf32, #tpu.memory_space<vmem>>
    tpu.enqueue_dma source(%33 : memref<128xf32, #tpu.memory_space<any>>) target(%35 : memref<128xf32, #tpu.memory_space<vmem>>) target_semaphore(%arg5 : memref<!tpu.dma_semaphore, #tpu.memory_space<semaphore_mem>>)
    %c9_i32 = arith.constant 9 : i32
    %c0_i32_14 = arith.constant 0 : i32
    %36 = tpu.memref_slice %arg3[%11, %c0_i32_14] : memref<64x128xf32, #tpu.memory_space<any>> -> memref<1x128xf32, #tpu.memory_space<any>>
    %37 = tpu.memref_squeeze %36 : memref<1x128xf32, #tpu.memory_space<any>> -> memref<128xf32, #tpu.memory_space<any>>
    %c0_i32_15 = arith.constant 0 : i32
    %c0_i32_16 = arith.constant 0 : i32
    %38 = tpu.memref_slice %arg4[%c0_i32_15, %c9_i32, %c0_i32_16] : memref<1x12x128xf32, #tpu.memory_space<vmem>> -> memref<1x1x128xf32, #tpu.memory_space<vmem>>
    %39 = tpu.memref_squeeze %38 : memref<1x1x128xf32, #tpu.memory_space<vmem>> -> memref<128xf32, #tpu.memory_space<vmem>>
    tpu.enqueue_dma source(%37 : memref<128xf32, #tpu.memory_space<any>>) target(%39 : memref<128xf32, #tpu.memory_space<vmem>>) target_semaphore(%arg5 : memref<!tpu.dma_semaphore, #tpu.memory_space<semaphore_mem>>)
    %c10_i32 = arith.constant 10 : i32
    %c0_i32_17 = arith.constant 0 : i32
    %40 = tpu.memref_slice %arg3[%13, %c0_i32_17] : memref<64x128xf32, #tpu.memory_space<any>> -> memref<1x128xf32, #tpu.memory_space<any>>
    %41 = tpu.memref_squeeze %40 : memref<1x128xf32, #tpu.memory_space<any>> -> memref<128xf32, #tpu.memory_space<any>>
    %c0_i32_18 = arith.constant 0 : i32
    %c0_i32_19 = arith.constant 0 : i32
    %42 = tpu.memref_slice %arg4[%c0_i32_18, %c10_i32, %c0_i32_19] : memref<1x12x128xf32, #tpu.memory_space<vmem>> -> memref<1x1x128xf32, #tpu.memory_space<vmem>>
    %43 = tpu.memref_squeeze %42 : memref<1x1x128xf32, #tpu.memory_space<vmem>> -> memref<128xf32, #tpu.memory_space<vmem>>
    tpu.enqueue_dma source(%41 : memref<128xf32, #tpu.memory_space<any>>) target(%43 : memref<128xf32, #tpu.memory_space<vmem>>) target_semaphore(%arg5 : memref<!tpu.dma_semaphore, #tpu.memory_space<semaphore_mem>>)
    %c11_i32 = arith.constant 11 : i32
    %c0_i32_20 = arith.constant 0 : i32
    %44 = tpu.memref_slice %arg3[%15, %c0_i32_20] : memref<64x128xf32, #tpu.memory_space<any>> -> memref<1x128xf32, #tpu.memory_space<any>>
    %45 = tpu.memref_squeeze %44 : memref<1x128xf32, #tpu.memory_space<any>> -> memref<128xf32, #tpu.memory_space<any>>
    %c0_i32_21 = arith.constant 0 : i32
    %c0_i32_22 = arith.constant 0 : i32
    %46 = tpu.memref_slice %arg4[%c0_i32_21, %c11_i32, %c0_i32_22] : memref<1x12x128xf32, #tpu.memory_space<vmem>> -> memref<1x1x128xf32, #tpu.memory_space<vmem>>
    %47 = tpu.memref_squeeze %46 : memref<1x1x128xf32, #tpu.memory_space<vmem>> -> memref<128xf32, #tpu.memory_space<vmem>>
    tpu.enqueue_dma source(%45 : memref<128xf32, #tpu.memory_space<any>>) target(%47 : memref<128xf32, #tpu.memory_space<vmem>>) target_semaphore(%arg5 : memref<!tpu.dma_semaphore, #tpu.memory_space<semaphore_mem>>)
    %c0_23 = arith.constant 0 : index
    %c0_24 = arith.constant 0 : index
    %48 = vector.load %arg2[%c0_23, %c0_24] : memref<4x128xf32, #tpu.memory_space<vmem>>, vector<4x128xf32>
    %c0_25 = arith.constant 0 : index
    %c0_26 = arith.constant 0 : index
    %c0_27 = arith.constant 0 : index
    %49 = vector.load %arg4[%c0_25, %c0_26, %c0_27] : memref<1x12x128xf32, #tpu.memory_space<vmem>>, vector<1x4x128xf32>
    %50 = vector.shape_cast %49 : vector<1x4x128xf32> to vector<4x128xf32>
    %51 = vector.shape_cast %48 : vector<4x128xf32> to vector<1x4x128xf32>
    tpu.vector_store %arg4[%c0_25, %c0_26, %c0_27], %51 {strides = array<i32>} : memref<1x12x128xf32, #tpu.memory_space<vmem>>, vector<1x4x128xf32>,
    %c4_i32_28 = arith.constant 4 : i32
    %c0_i32_29 = arith.constant 0 : i32
    %52 = tpu.memref_slice %arg3[%1, %c0_i32_29] : memref<64x128xf32, #tpu.memory_space<any>> -> memref<1x128xf32, #tpu.memory_space<any>>
    %53 = tpu.memref_squeeze %52 : memref<1x128xf32, #tpu.memory_space<any>> -> memref<128xf32, #tpu.memory_space<any>>
    %c0_i32_30 = arith.constant 0 : i32
    %c0_i32_31 = arith.constant 0 : i32
    %54 = tpu.memref_slice %arg4[%c0_i32_30, %c4_i32_28, %c0_i32_31] : memref<1x12x128xf32, #tpu.memory_space<vmem>> -> memref<1x1x128xf32, #tpu.memory_space<vmem>>
    %55 = tpu.memref_squeeze %54 : memref<1x1x128xf32, #tpu.memory_space<vmem>> -> memref<128xf32, #tpu.memory_space<vmem>>
    tpu.wait_dma2 semaphore(%arg5 : memref<!tpu.dma_semaphore, #tpu.memory_space<semaphore_mem>>) src(%53 : memref<128xf32, #tpu.memory_space<any>>) dst(%55 : memref<128xf32, #tpu.memory_space<vmem>>)
    %c5_i32_32 = arith.constant 5 : i32
    %c0_i32_33 = arith.constant 0 : i32
    %56 = tpu.memref_slice %arg3[%3, %c0_i32_33] : memref<64x128xf32, #tpu.memory_space<any>> -> memref<1x128xf32, #tpu.memory_space<any>>
    %57 = tpu.memref_squeeze %56 : memref<1x128xf32, #tpu.memory_space<any>> -> memref<128xf32, #tpu.memory_space<any>>
    %c0_i32_34 = arith.constant 0 : i32
    %c0_i32_35 = arith.constant 0 : i32
    %58 = tpu.memref_slice %arg4[%c0_i32_34, %c5_i32_32, %c0_i32_35] : memref<1x12x128xf32, #tpu.memory_space<vmem>> -> memref<1x1x128xf32, #tpu.memory_space<vmem>>
    %59 = tpu.memref_squeeze %58 : memref<1x1x128xf32, #tpu.memory_space<vmem>> -> memref<128xf32, #tpu.memory_space<vmem>>
    tpu.wait_dma2 semaphore(%arg5 : memref<!tpu.dma_semaphore, #tpu.memory_space<semaphore_mem>>) src(%57 : memref<128xf32, #tpu.memory_space<any>>) dst(%59 : memref<128xf32, #tpu.memory_space<vmem>>)
    %c6_i32_36 = arith.constant 6 : i32
    %c0_i32_37 = arith.constant 0 : i32
    %60 = tpu.memref_slice %arg3[%5, %c0_i32_37] : memref<64x128xf32, #tpu.memory_space<any>> -> memref<1x128xf32, #tpu.memory_space<any>>
    %61 = tpu.memref_squeeze %60 : memref<1x128xf32, #tpu.memory_space<any>> -> memref<128xf32, #tpu.memory_space<any>>
    %c0_i32_38 = arith.constant 0 : i32
    %c0_i32_39 = arith.constant 0 : i32
    %62 = tpu.memref_slice %arg4[%c0_i32_38, %c6_i32_36, %c0_i32_39] : memref<1x12x128xf32, #tpu.memory_space<vmem>> -> memref<1x1x128xf32, #tpu.memory_space<vmem>>
    %63 = tpu.memref_squeeze %62 : memref<1x1x128xf32, #tpu.memory_space<vmem>> -> memref<128xf32, #tpu.memory_space<vmem>>
    tpu.wait_dma2 semaphore(%arg5 : memref<!tpu.dma_semaphore, #tpu.memory_space<semaphore_mem>>) src(%61 : memref<128xf32, #tpu.memory_space<any>>) dst(%63 : memref<128xf32, #tpu.memory_space<vmem>>)
    %c7_i32_40 = arith.constant 7 : i32
    %c0_i32_41 = arith.constant 0 : i32
    %64 = tpu.memref_slice %arg3[%7, %c0_i32_41] : memref<64x128xf32, #tpu.memory_space<any>> -> memref<1x128xf32, #tpu.memory_space<any>>
    %65 = tpu.memref_squeeze %64 : memref<1x128xf32, #tpu.memory_space<any>> -> memref<128xf32, #tpu.memory_space<any>>
    %c0_i32_42 = arith.constant 0 : i32
    %c0_i32_43 = arith.constant 0 : i32
    %66 = tpu.memref_slice %arg4[%c0_i32_42, %c7_i32_40, %c0_i32_43] : memref<1x12x128xf32, #tpu.memory_space<vmem>> -> memref<1x1x128xf32, #tpu.memory_space<vmem>>
    %67 = tpu.memref_squeeze %66 : memref<1x1x128xf32, #tpu.memory_space<vmem>> -> memref<128xf32, #tpu.memory_space<vmem>>
    tpu.wait_dma2 semaphore(%arg5 : memref<!tpu.dma_semaphore, #tpu.memory_space<semaphore_mem>>) src(%65 : memref<128xf32, #tpu.memory_space<any>>) dst(%67 : memref<128xf32, #tpu.memory_space<vmem>>)
    %c8_i32_44 = arith.constant 8 : i32
    %c0_i32_45 = arith.constant 0 : i32
    %68 = tpu.memref_slice %arg3[%9, %c0_i32_45] : memref<64x128xf32, #tpu.memory_space<any>> -> memref<1x128xf32, #tpu.memory_space<any>>
    %69 = tpu.memref_squeeze %68 : memref<1x128xf32, #tpu.memory_space<any>> -> memref<128xf32, #tpu.memory_space<any>>
    %c0_i32_46 = arith.constant 0 : i32
    %c0_i32_47 = arith.constant 0 : i32
    %70 = tpu.memref_slice %arg4[%c0_i32_46, %c8_i32_44, %c0_i32_47] : memref<1x12x128xf32, #tpu.memory_space<vmem>> -> memref<1x1x128xf32, #tpu.memory_space<vmem>>
    %71 = tpu.memref_squeeze %70 : memref<1x1x128xf32, #tpu.memory_space<vmem>> -> memref<128xf32, #tpu.memory_space<vmem>>
    tpu.wait_dma2 semaphore(%arg5 : memref<!tpu.dma_semaphore, #tpu.memory_space<semaphore_mem>>) src(%69 : memref<128xf32, #tpu.memory_space<any>>) dst(%71 : memref<128xf32, #tpu.memory_space<vmem>>)
    %c9_i32_48 = arith.constant 9 : i32
    %c0_i32_49 = arith.constant 0 : i32
    %72 = tpu.memref_slice %arg3[%11, %c0_i32_49] : memref<64x128xf32, #tpu.memory_space<any>> -> memref<1x128xf32, #tpu.memory_space<any>>
    %73 = tpu.memref_squeeze %72 : memref<1x128xf32, #tpu.memory_space<any>> -> memref<128xf32, #tpu.memory_space<any>>
    %c0_i32_50 = arith.constant 0 : i32
    %c0_i32_51 = arith.constant 0 : i32
    %74 = tpu.memref_slice %arg4[%c0_i32_50, %c9_i32_48, %c0_i32_51] : memref<1x12x128xf32, #tpu.memory_space<vmem>> -> memref<1x1x128xf32, #tpu.memory_space<vmem>>
    %75 = tpu.memref_squeeze %74 : memref<1x1x128xf32, #tpu.memory_space<vmem>> -> memref<128xf32, #tpu.memory_space<vmem>>
    tpu.wait_dma2 semaphore(%arg5 : memref<!tpu.dma_semaphore, #tpu.memory_space<semaphore_mem>>) src(%73 : memref<128xf32, #tpu.memory_space<any>>) dst(%75 : memref<128xf32, #tpu.memory_space<vmem>>)
    %c10_i32_52 = arith.constant 10 : i32
    %c0_i32_53 = arith.constant 0 : i32
    %76 = tpu.memref_slice %arg3[%13, %c0_i32_53] : memref<64x128xf32, #tpu.memory_space<any>> -> memref<1x128xf32, #tpu.memory_space<any>>
    %77 = tpu.memref_squeeze %76 : memref<1x128xf32, #tpu.memory_space<any>> -> memref<128xf32, #tpu.memory_space<any>>
    %c0_i32_54 = arith.constant 0 : i32
    %c0_i32_55 = arith.constant 0 : i32
    %78 = tpu.memref_slice %arg4[%c0_i32_54, %c10_i32_52, %c0_i32_55] : memref<1x12x128xf32, #tpu.memory_space<vmem>> -> memref<1x1x128xf32, #tpu.memory_space<vmem>>
    %79 = tpu.memref_squeeze %78 : memref<1x1x128xf32, #tpu.memory_space<vmem>> -> memref<128xf32, #tpu.memory_space<vmem>>
    tpu.wait_dma2 semaphore(%arg5 : memref<!tpu.dma_semaphore, #tpu.memory_space<semaphore_mem>>) src(%77 : memref<128xf32, #tpu.memory_space<any>>) dst(%79 : memref<128xf32, #tpu.memory_space<vmem>>)
    %c11_i32_56 = arith.constant 11 : i32
    %c0_i32_57 = arith.constant 0 : i32
    %80 = tpu.memref_slice %arg3[%15, %c0_i32_57] : memref<64x128xf32, #tpu.memory_space<any>> -> memref<1x128xf32, #tpu.memory_space<any>>
    %81 = tpu.memref_squeeze %80 : memref<1x128xf32, #tpu.memory_space<any>> -> memref<128xf32, #tpu.memory_space<any>>
    %c0_i32_58 = arith.constant 0 : i32
    %c0_i32_59 = arith.constant 0 : i32
    %82 = tpu.memref_slice %arg4[%c0_i32_58, %c11_i32_56, %c0_i32_59] : memref<1x12x128xf32, #tpu.memory_space<vmem>> -> memref<1x1x128xf32, #tpu.memory_space<vmem>>
    %83 = tpu.memref_squeeze %82 : memref<1x1x128xf32, #tpu.memory_space<vmem>> -> memref<128xf32, #tpu.memory_space<vmem>>
    tpu.wait_dma2 semaphore(%arg5 : memref<!tpu.dma_semaphore, #tpu.memory_space<semaphore_mem>>) src(%81 : memref<128xf32, #tpu.memory_space<any>>) dst(%83 : memref<128xf32, #tpu.memory_space<vmem>>)
    return
  }
  func.func @transform_0(%arg0: i32, %arg1: memref<2x8xi32, #tpu.memory_space<smem>>) -> (i32, i32) {
    %c0_i32 = arith.constant 0 : i32
    %c0_i32_0 = arith.constant 0 : i32
    %c0_i32_1 = arith.constant 0 : i32
    return %c0_i32, %c0_i32_0 : i32, i32
  }
  func.func @transform_2(%arg0: i32, %arg1: memref<2x8xi32, #tpu.memory_space<smem>>) -> (i32, i32, i32) {
    %c0_i32 = arith.constant 0 : i32
    %c0_i32_0 = arith.constant 0 : i32
    %c0_i32_1 = arith.constant 0 : i32
    return %arg0, %c0_i32, %c0_i32_0 : i32, i32, i32
  }
}

module attributes {stable_mosaic.version = 11 : i64} {
  func.func @_prompt_mlp_kernel(%arg0: memref<4x32xf32, #tpu.memory_space<vmem>>, %arg1: memref<32x32xf32, #tpu.memory_space<vmem>>, %arg2: memref<1x32xf32, #tpu.memory_space<vmem>>, %arg3: memref<32x16xf32, #tpu.memory_space<vmem>>, %arg4: memref<1x16xf32, #tpu.memory_space<vmem>>, %arg5: memref<16x512xf32, #tpu.memory_space<vmem>>, %arg6: memref<1x512xf32, #tpu.memory_space<vmem>>, %arg7: memref<1x512xf32, #tpu.memory_space<vmem>>) attributes {dimension_semantics = [], scalar_prefetch = 0 : i64, scratch_operands = 0 : i64, tpu.core_type = #tpu.core_type<tc>} {
    %c3 = arith.constant 3 : index
    %c0 = arith.constant 0 : index
    %0 = vector.load %arg0[%c3, %c0] : memref<4x32xf32, #tpu.memory_space<vmem>>, vector<1x32xf32>
    %c0_0 = arith.constant 0 : index
    %c0_1 = arith.constant 0 : index
    %1 = vector.load %arg1[%c0_0, %c0_1] : memref<32x32xf32, #tpu.memory_space<vmem>>, vector<32x32xf32>
    %cst = arith.constant dense<0.000000e+00> : vector<1x32xf32>
    %2 = tpu.matmul %0, %1, %cst {dimension_numbers = #tpu.dot_dimension_numbers<[1], [0], [0], [1], [0, 0, 1, 1], [], []>} : vector<1x32xf32>, vector<32x32xf32>, vector<1x32xf32> -> vector<1x32xf32>
    %c0_2 = arith.constant 0 : index
    %c0_3 = arith.constant 0 : index
    %3 = vector.load %arg2[%c0_2, %c0_3] : memref<1x32xf32, #tpu.memory_space<vmem>>, vector<1x32xf32>
    %4 = arith.addf %2, %3 : vector<1x32xf32>
    %5 = math.tanh %4 : vector<1x32xf32>
    %c0_4 = arith.constant 0 : index
    %c0_5 = arith.constant 0 : index
    %6 = vector.load %arg3[%c0_4, %c0_5] : memref<32x16xf32, #tpu.memory_space<vmem>>, vector<32x16xf32>
    %cst_6 = arith.constant dense<0.000000e+00> : vector<1x16xf32>
    %7 = tpu.matmul %5, %6, %cst_6 {dimension_numbers = #tpu.dot_dimension_numbers<[1], [0], [0], [1], [0, 0, 1, 1], [], []>} : vector<1x32xf32>, vector<32x16xf32>, vector<1x16xf32> -> vector<1x16xf32>
    %c0_7 = arith.constant 0 : index
    %c0_8 = arith.constant 0 : index
    %8 = vector.load %arg4[%c0_7, %c0_8] : memref<1x16xf32, #tpu.memory_space<vmem>>, vector<1x16xf32>
    %9 = arith.addf %7, %8 : vector<1x16xf32>
    %cst_9 = arith.constant 0.000000e+00 : f32
    %10 = vector.broadcast %cst_9 : f32 to vector<1x16xf32>
    %11 = arith.maximumf %9, %10 : vector<1x16xf32>
    %c0_10 = arith.constant 0 : index
    %c0_11 = arith.constant 0 : index
    %12 = vector.load %arg5[%c0_10, %c0_11] : memref<16x512xf32, #tpu.memory_space<vmem>>, vector<16x512xf32>
    %cst_12 = arith.constant dense<0.000000e+00> : vector<1x512xf32>
    %13 = tpu.matmul %11, %12, %cst_12 {dimension_numbers = #tpu.dot_dimension_numbers<[1], [0], [0], [1], [0, 0, 1, 1], [], []>} : vector<1x16xf32>, vector<16x512xf32>, vector<1x512xf32> -> vector<1x512xf32>
    %c0_13 = arith.constant 0 : index
    %c0_14 = arith.constant 0 : index
    %14 = vector.load %arg6[%c0_13, %c0_14] : memref<1x512xf32, #tpu.memory_space<vmem>>, vector<1x512xf32>
    %15 = arith.addf %13, %14 : vector<1x512xf32>
    %c0_15 = arith.constant 0 : index
    %c0_16 = arith.constant 0 : index
    %16 = vector.load %arg7[%c0_15, %c0_16] : memref<1x512xf32, #tpu.memory_space<vmem>>, vector<1x512xf32>
    tpu.vector_store %arg7[%c0_15, %c0_16], %15 {strides = array<i32>} : memref<1x512xf32, #tpu.memory_space<vmem>>, vector<1x512xf32>,
    return
  }
}

</mosaic_0001>

<bundles_post_ra>
// kernel: prompt_encoder_input_processor.3
= control target key start
LH: loop header
LB: loop body
LE: loop exit
PB: predicated region body
PF: predicated region fallthrough
CT: control target
= control target key end

     0   :  { %s807_s0 = inlined_call_operand.vmem [shape: s32[2,8], index: 0, kind: input, shape index: {}]   ;;  %s808_s1 = inlined_call_operand.vmem [shape: f32[4,128], index: 1, kind: input, shape index: {}]   ;;  %s809_s2 = inlined_call_operand.vmem [shape: f32[64,128], index: 2, kind: input, shape index: {}]   ;;  %s810_s3 = inlined_call_operand.vmem [shape: f32[2,12,128], index: 3, kind: output, shape index: {}]  }
   0x1   :  { %s8_s14 = sshll.u32 %s807_s0, 4  ;;  %s9_s14 = int_to_ptr.vmem [resolvable:$true] %s8_s14 }
   0x2   :  { %s704_s15 = scalar_lea.vmem %s9_s14, 32  ;;  %p709_p1 = scmp.lt.s32.totalorder %s9_s14, %s9_s14 }
   0x3   :  { %p705_p0 = scmp.ne.s32.totalorder %s9_s14, %s704_s15  ;;  %p710_p2 = scmp.lt.s32.totalorder %s704_s15, %s704_s15 }
   0x5   :  { %p711_p3 = por %p710_p2, %p709_p1 }
   0x7   :  { %p712_p4 = pnand %p711_p3, %p705_p0 }
   0x9   :  { %715 = shalt.err (!%p712_p4)  }
   0xa   :  { %s728_s16 = smov [#allocation4]  }
   0xb   :  { %11 = dma.vmem_to_smem %s9_s14, 32, %s728_s16, [#allocation3] }
   0xc   :  { %720 = dma.done.wait [#allocation3], 32 }
   0xd   :  { %721 = vsyncadd [#allocation3], 4294967264 }
   0xe   :  { %13 = sfence }
   0xf   :  { %s752_s17 = smov 0  }
  0x10 LB: > { %s668_s0 = sadd.s32 4294967295, %s726_s17   ;;  %p671_p5 = scmp.ge.s32.totalorder %s726_s17, 1  ;;  %s726_s17 = sphi %s752_s17, %s19_s17  }
  0x11   : > { %p85_p6 = scmp.lt.s32.totalorder %s726_s17, 3 }
  0x13   : > { %p86_p7 = pnand %p671_p5, %p85_p6 }
  0x14   : > { %p100_p8 = scmp.lt.s32.totalorder (!%p86_p7), %s668_s0, 1  ;;  %s674_s18 = sshll.u32 (!%p86_p7), %s668_s0, 7 }
  0x15   : > { %89 = sbr.rel (%p86_p7) target bundleno = 58 (0x3a), region = 24  ;;  %s106_s19 = sld [smem:[#allocation4 + %s674_s18]] (!%p86_p7) }
  0x16   : > { %s107_s20 = sadd.s32 (!%p86_p7), 1, %s674_s18  ;;  %s109_s22 = sadd.s32 (!%p86_p7), 2, %s674_s18 }
  0x17   : > { %s108_s21 = sld [smem:[#allocation4 + %s107_s20]] (!%p86_p7)  ;;  %s111_s28 = sadd.s32 (!%p86_p7), 3, %s674_s18 }
  0x18   : > { %s110_s24 = sld [smem:[#allocation4 + %s109_s22]] (!%p86_p7)  ;;  %s113_s30 = sadd.s32 (!%p86_p7), 4, %s674_s18 }
  0x19   : > { %s112_s29 = sld [smem:[#allocation4 + %s111_s28]] (!%p86_p7)  ;;  %s115_s5 = sadd.s32 (!%p86_p7), 5, %s674_s18 }
  0x1a   : > { %s812_s0 = smov (!%p100_p8, %s668_s0), 1  ;;  %s114_s4 = sld [smem:[#allocation4 + %s113_s30]] }
  0x1b   : > { %s694_s23 = sshll.u32 %s812_s0, 4  ;;  %s116_s6 = sld [smem:[#allocation4 + %s115_s5]] }
  0x1c   : > { %s763_s27 = scalar_lea.vmem %s810_s3, %s694_s23  ;;  %s117_s7 = sadd.s32 6, %s674_s18 }
  0x1d   : > { %s118_s8 = sld [smem:[#allocation4 + %s117_s7]]  ;;  %s119_s9 = sadd.s32 7, %s674_s18 }
  0x1e   : > { %s765_s10 = sld [smem:[#allocation4 + %s119_s9]]  ;;  %s121_s13 = scalar_lea.vmem %s809_s2, %s106_s19 }
  0x1f   : > { %v141_v0 = vld [vmem:[%s121_s13] sm:$0x1] }
  0x20   : > { %676 = vst [vmem:[%s763_s27 + $0x4] sm:$0x1] %v141_v0 }
  0x21   : > { %168 = vsyncadd [#allocation2], 16  ;;  %s169_s16 = scalar_lea.vmem %s809_s2, %s108_s21 }
  0x22   : > { %v189_v1 = vld [vmem:[%s169_s16] sm:$0x1] }
  0x23   : > { %678 = vst [vmem:[%s763_s27 + $0x5] sm:$0x1] %v189_v1 }
  0x24   : > { %216 = vsyncadd [#allocation2], 16  ;;  %s217_s18 = scalar_lea.vmem %s809_s2, %s110_s24 }
  0x25   : > { %v237_v2 = vld [vmem:[%s217_s18] sm:$0x1] }
  0x26   : > { %680 = vst [vmem:[%s763_s27 + $0x6] sm:$0x1] %v237_v2 }
  0x27   : > { %264 = vsyncadd [#allocation2], 16  ;;  %s265_s23 = scalar_lea.vmem %s809_s2, %s112_s29 }
  0x28   : > { %v285_v3 = vld [vmem:[%s265_s23] sm:$0x1] }
  0x29   : > { %682 = vst [vmem:[%s763_s27 + $0x7] sm:$0x1] %v285_v3 }
  0x2a   : > { %312 = vsyncadd [#allocation2], 16  ;;  %s313_s26 = scalar_lea.vmem %s809_s2, %s114_s4 }
  0x2b   : > { %v333_v4 = vld [vmem:[%s313_s26] sm:$0x1] }
  0x2c   : > { %684 = vst [vmem:[%s763_s27 + $0x8] sm:$0x1] %v333_v4 }
  0x2d   : > { %360 = vsyncadd [#allocation2], 16  ;;  %s361_s30 = scalar_lea.vmem %s809_s2, %s116_s6 }
  0x2e   : > { %v381_v5 = vld [vmem:[%s361_s30] sm:$0x1] }
  0x2f   : > { %686 = vst [vmem:[%s763_s27 + $0x9] sm:$0x1] %v381_v5 }
  0x30   : > { %408 = vsyncadd [#allocation2], 16  ;;  %s409_s7 = scalar_lea.vmem %s809_s2, %s118_s8 }
  0x31   : > { %v429_v6 = vld [vmem:[%s409_s7] sm:$0x1] }
  0x32   : > { %688 = vst [vmem:[%s763_s27 + $0xa] sm:$0x1] %v429_v6 }
  0x33   : > { %456 = vsyncadd [#allocation2], 16  ;;  %s457_s11 = scalar_lea.vmem %s809_s2, %s765_s10 }
  0x34   : > { %v477_v7 = vld [vmem:[%s457_s11] sm:$0x1] }
  0x35   : > { %690 = vst [vmem:[%s763_s27 + $0xb] sm:$0x1] %v477_v7 }
  0x36   : > { %504 = vsyncadd [#allocation2], 16  ;;  %v505_v8 = vld [vmem:[%s808_s1] sm:$0xf] }
  0x37   : > { %506 = vst [vmem:[%s763_s27] sm:$0xf] %v505_v8 }
  0x38   : > { %722 = dma.done.wait [#allocation2], 128 }
  0x39   : > { %723 = vsyncadd [#allocation2], 4294967168 }
  0x3a PF: > { %s19_s17 = sadd.s32 1, %s726_s17  }
  0x3b   : > { %p16_p9 = scmp.ge.s32.totalorder %s19_s17, 4  }
  0x3d   :  { %18 = sbr.rel (!%p16_p9) target bundleno = 16 (0x10), region = 387 }
  0x42   :  { %544 = vsyncmov [#allocation2] }
  0x45   :  { %s545_s8 = vpop.sfrf %544 }
  0x46   :  { %p693_p10 = scmp.ne.s32.totalorder %s545_s8, 0 }
  0x48   :  { %549 = shalt.err (%p693_p10)  }

// kernel: prompt_encoder_input_processor.2
= control target key start
LH: loop header
LB: loop body
LE: loop exit
PB: predicated region body
PF: predicated region fallthrough
CT: control target
= control target key end

     0   :  { %12 = vsyncpa [#allocation3], 0  ;;  %s481_s24 = smov [#allocation2]   ;;  %s571_s0 = inlined_call_operand.vmem [shape: f32[4,32], index: 0, kind: input, shape index: {}]   ;;  %s572_s1 = inlined_call_operand.vmem [shape: f32[32,32], index: 1, kind: input, shape index: {}]   ;;  %s573_s2 = inlined_call_operand.vmem [shape: f32[1,32], index: 2, kind: input, shape index: {}]   ;;  %s574_s3 = inlined_call_operand.vmem [shape: f32[32,16], index: 3, kind: input, shape index: {}]   ;;  %s575_s4 = inlined_call_operand.vmem [shape: f32[1,16], index: 4, kind: input, shape index: {}]   ;;  %s576_s5 = inlined_call_operand.hbm [shape: f32[16,512], index: 5, kind: input, shape index: {}]   ;;  %s577_s6 = inlined_call_operand.vmem [shape: f32[1,512], index: 6, kind: input, shape index: {}]   ;;  %s578_s7 = inlined_call_operand.vmem [shape: f32[1,512], index: 7, kind: output, shape index: {}]  }
   0x1   :  { %s28_s25 = sshll.u32 %s481_s24, 4  ;;  %s29_s25 = int_to_ptr.vmem [resolvable:$true] %s28_s25 }
   0x2   :  { %s467_s26 = scalar_lea.vmem %s29_s25, 1024  ;;  %p472_p1 = scmp.lt.s32.totalorder %s29_s25, %s29_s25 }
   0x3   :  { %p468_p0 = scmp.ne.s32.totalorder %s29_s25, %s467_s26  ;;  %p473_p2 = scmp.lt.s32.totalorder %s467_s26, %s467_s26 }
   0x5   :  { %p474_p3 = por %p473_p2, %p472_p1 }
   0x7   :  { %p475_p4 = pnand %p474_p3, %p468_p0 }
   0x9   :  { %478 = shalt.err (!%p475_p4)
}
   0xa   :  { %s482_s27 = smov 512   ;;  %s483_s28 = smov 32  }
   0xb   :  { %34 = dma.hbm_to_vmem [thread:$0]  %s576_s5, 1024, %s29_s25, [#allocation3], %s482_s27, %s482_s27, %s483_s28  }
   0xc   :  { %479 = dma.done.wait [#allocation3], 1024  }
   0xd   :  { %480 = vsyncadd [#allocation3], 4294966272  ;;  %v484_v0 = vmov 0.0   ;;  %vm485_vm0 = vmmov 0   ;;  %v44_v1 = vld [vmem:[%s572_s1 + $0x18] sm:$0xff]  ;;  %v43_v2 = vld [vmem:[%s572_s1 + $0x10] sm:$0xff]  ;;  %v210_v28 = vlaneseq }
   0xe   :  { %429 = vmatprep.subr.mxu0 %v484_v0  ;;  %437 = vmatprep.mubr.msk.f32.mxu0 %vm485_vm0, %v484_v0  ;;  %v42_v3 = vld [vmem:[%s572_s1 + $0x8] sm:$0xff]  ;;  %v41_v4 = vld [vmem:[%s572_s1] sm:$0xff]  ;;  %vm46_vm1 = vcmask 261120   ;;  %v124_v6 = vld [vmem:[%s574_s3 + $0x18] sm:$0xff]  ;;  %vm230_vm2 = vcmask 130048  }
   0xf   :  { %440 = vmatprep.subr.mxu1 %v484_v0  ;;  %448 = vmatprep.mubr.msk.f32.mxu1 %vm485_vm0, %v484_v0  ;;  %v40_v5 = vld [vmem:[%s571_s0 + $0x3] sm:$0x1]  ;;  %v123_v7 = vld [vmem:[%s574_s3 + $0x10] sm:$0xff]  ;;  %v122_v8 = vld [vmem:[%s574_s3 + $0x8] sm:$0xff]  ;;  %v211_v29 = vshrl.u32 %v210_v28, 7  ;;  %vm407_vm3 = vcmp.lt.s32.totalorder %v210_v28, 512 }
  0x10   :  { %430 = vmatpush3.msra.mxu0 %v44_v1  ;;  %441 = vmatpush3.msra.mxu1 %v124_v6  ;;  %v121_v9 = vld [vmem:[%s574_s3] sm:$0xff]  ;;  %v205_v15 = vld [vmem:[#allocation2 + $0x28] sm:$0xff]  ;;  %v207_v16 = vld [vmem:[#allocation2 + $0x38] sm:$0xff]  ;;  %v486_v30 = vmov 1966171168  }
  0x11   :  { %431 = vmatprep.subr.mxu0 %v484_v0  ;;  %442 = vmatprep.subr.mxu1 %v484_v0  ;;  %v45_v10 = vld [vmem:[%s573_s2] sm:$0x1]  ;;  %v206_v18 = vld [vmem:[#allocation2 + $0x30] sm:$0xff]  ;;  %v201_v19 = vld [vmem:[#allocation2 + $0x8] sm:$0xff]  ;;  %v383_v31 = vunpack.c.l.s4 %v486_v30  ;;  %v212_v32 = vsub.s32 0, %v211_v29  ;;  %v220_v33 = vsub.s32 2, %v211_v29 }
  0x12   :  { %432 = vmatpush3.msra.mxu0 %v43_v2  ;;  %443 = vmatpush3.msra.mxu1 %v123_v7  ;;  %v204_v17 = vld [vmem:[#allocation2 + $0x20] sm:$0xff]  ;;  %v203_v20 = vld [vmem:[#allocation2 + $0x18] sm:$0xff]  ;;  %v202_v22 = vld [vmem:[#allocation2 + $0x10] sm:$0xff]  ;;  %v216_v34 = vsub.s32 1, %v211_v29  ;;  %v224_v35 = vsub.s32 3, %v211_v29 }
  0x13   :  { %433 = vmatprep.subr.mxu0 %v484_v0  ;;  %444 = vmatprep.subr.mxu1 %v484_v0  ;;  %v200_v21 = vld [vmem:[#allocation2] sm:$0xff]  ;;  %v384_v37 = vunpack.c.0.s8 %v383_v31 }
  0x14   :  { %434 = vmatpush3.msra.mxu0 %v42_v3  ;;  %445 = vmatpush3.msra.mxu1 %v122_v8  ;;  %v125_v23 = vld [vmem:[%s575_s4] sm:$0x1] }
  0x15   :  { %435 = vmatprep.subr.mxu0 %v484_v0  ;;  %446 = vmatprep.subr.mxu1 %v484_v0  ;;  %v208_v36 = vld [vmem:[%s577_s6] sm:$0xf]  ;;  %v387_v45 = vsub.s32 %v384_v37, %v211_v29 }
  0x16   :  { %436 = vmatpush3.msra.mxu0 %v41_v4  ;;  %447 = vmatpush3.msra.mxu1 %v121_v9  ;;  %v213_v38 = vrot.slane %v208_v36, %v212_v32  ;;  %v221_v39 = vrot.slane %v208_v36, %v220_v33  ;;  %v217_v40 = vrot.slane %v208_v36, %v216_v34 }
  0x17   :  { %438 = vmatmul.mubr.msk.f32.vlgmr.msra.gmra.mxu0 %vm46_vm1, %v40_v5  ;;  %262 = vmatprep.subr.mxu0 %v205_v15  ;;  %v225_v41 = vrot.slane %v208_v36, %v224_v35 }
  0x18   :  { %298 = vmatprep.mubr.f32.mxu0 %v484_v0  ;;  %333 = vmatprep.subr.mxu1 %v207_v16 }
  0x19   :  { %263 = vmatpush1.msra.mxu0 %v204_v17 }
  0x1a   :  { %264 = vmatprep.subr.mxu0 %v201_v19 }
  0x1b   :  { %265 = vmatpush1.msra.mxu0 %v200_v21 }
  0xd7   :  { %v116_v11 = vpop.f32.mrf.mxu0 }
  0xd8   :  { %v117_v12 = vadd.f32 %v116_v11, %v45_v10 }
  0xd9   :  { %v439_v13 = vpop.f32.mrf.mxu0 }
  0xda   :  { %457 = vtanh.f32 %v117_v12 }
  0xe7   :  { %v458_v14 = vpop.eup %457 }
  0xe8   :  { %449 = vmatmul.mubr.msk.f32.vlgmr.msra.gmra.mxu1 %vm46_vm1, %v458_v14 }
  0xe9   :  { %369 = vmatprep.mubr.f32.mxu1 %v484_v0  ;;  %334 = vmatpush1.msra.mxu1 %v206_v18 }
  0xea   :  { %335 = vmatprep.subr.mxu1 %v203_v20 }
  0xeb   :  { %336 = vmatpush1.msra.mxu1 %v202_v22 }
 0x1a8   :  { %v195_v24 = vpop.f32.mrf.mxu1 }
 0x1a9   :  { %v196_v25 = vadd.f32 %v195_v24, %v125_v23 }
 0x1aa   :  { %v450_v26 = vpop.f32.mrf.mxu1 }
 0x1ab   :  { %v199_v27 = vmax.f32 %v196_v25, 0.0 }
 0x1ad   :  { %417 = vmatmul.mubr.msk.f32.vlgmr.msra.gmra.mxu0 %vm230_vm2, %v199_v27  ;;  %418 = vmatmul.mubr.msk.f32.vlgmr.msra.gmra.mxu1 %vm230_vm2, %v199_v27 }
 0x26d   :  { %v300_v42 = vpop.f32.mrf.mxu0  ;;  %v371_v43 = vpop.f32.mrf.mxu1 }
 0x26e   :  { %v301_v47 = vadd.f32 %v300_v42, %v213_v38  ;;  %v372_v48 = vadd.f32 %v371_v43, %v221_v39 }
 0x26f   :  { %v302_v44 = vpop.f32.mrf.mxu0  ;;  %v373_v46 = vpop.f32.mrf.mxu1 }
 0x270   :  { %v303_v49 = vadd.f32 %v302_v44, %v217_v40  ;;  %v374_v50 = vadd.f32 %v373_v46, %v225_v41 }
 0x272   :  { %v380_v51 = vcombine.low %v301_v47, %v303_v49  ;;  %v381_v52 = vcombine.low %v372_v48, %v374_v50 }
 0x274   :  { %v388_v53 = vrot.slane %v380_v51, %v387_v45  ;;  %v395_v54 = vrot.slane %v381_v52, %v387_v45 }
 0x276   :  { %v396_v55 = vcombine.low %v388_v53, %v395_v54 }
 0x278   :  { %v403_v56 = vrot.slane %v396_v55, %v387_v45 }
 0x27a   :  { %409 = vst.msk [vmem:[%s578_s7] sm:$0xf] %vm407_vm3, %v403_v56 }
 0x27b   :  { %414 = vsyncpa [#allocation3], 1 }

</bundles_post_ra>
